<compile_context>
chip_gen: v7x
topology: tpu7x:2x2x1
jax: 0.10.0
libtpu: 0.0.40
codegen_flags: <defaults>
</compile_context>

<pallas_src>
import functools

import jax
import jax.numpy as jnp
from jax.experimental import pallas as pl
from jax.experimental.pallas import tpu as pltpu

_LANE = 128
_SUBLANE = 8


def _round_up(x: int, m: int) -> int:
    return ((x + m - 1) // m) * m


def _grid_steps_for_device() -> int:
    """Minimum useful number of batch-grid steps: 2 on v7x (2 TCs), else 1."""
    try:
        kind = jax.devices()[0].device_kind.lower()
    except Exception:  # pragma: no cover - defensive; detection is best-effort
        return 1
    return 2 if "v7" in kind else 1


def _hopfield_kernel(*refs, apply_hopfield: bool, use_bf16_matmul: bool):
    if apply_hopfield:
        x_ref, w1_ref, b1_ref, wh_ref, bh_ref, w2_ref, b2_ref, o_ref = refs
    else:
        x_ref, w1_ref, b1_ref, w2_ref, b2_ref, o_ref = refs

    def mm(act, w_ref):
        # bf16 operands -> single-pass MXU issue; f32 accumulate; everything
        # around the dot (bias add, sigmoid, relu) remains f32 on the VPU/EUP.
        w = w_ref[...]
        if use_bf16_matmul:
            act = act.astype(jnp.bfloat16)
            w = w.astype(jnp.bfloat16)
        return jnp.dot(act, w, preferred_element_type=jnp.float32)

    x = x_ref[...]

    # linear1 + sigmoid.
    h = jax.nn.sigmoid(mm(x, w1_ref) + b1_ref[...])

    # HopfieldLayer: every generation recomputes relu(linear(h)) on the SAME h,
    # so R >= 1 generations == exactly one matmul (dead work removed).
    if apply_hopfield:
        rec = jnp.maximum(mm(h, wh_ref) + bh_ref[...], 0.0)
    else:  # recurrent_generations == 0 -> pass h through unchanged.
        rec = h

    # linear2 + sigmoid (output lane-padded to a multiple of 128 -> unmasked vst).
    y = jax.nn.sigmoid(mm(rec, w2_ref) + b2_ref[...])
    o_ref[...] = y.astype(o_ref.dtype)


def hopfield_forward(x, w1, b1, wh, bh, w2, b2, *,
                     recurrent_generations: int,
                     use_bf16_matmul: bool = True,
                     max_tile_b: int = 2048):
    """x: [B, in_dim]; w*: [in, out] (already transposed); b*: [1, out]."""
    B, in_dim = x.shape
    hidden_dim = w1.shape[1]
    out_dim = w2.shape[1]
    apply_hopfield = recurrent_generations >= 1

    # --- Lane-dense output: zero-pad W2/b2 columns to a multiple of 128. ---
    out_pad = _round_up(max(out_dim, _LANE), _LANE)
    if out_pad != out_dim:
        w2p = jnp.zeros((hidden_dim, out_pad), w2.dtype).at[:, :out_dim].set(w2)
        b2p = jnp.zeros((1, out_pad), b2.dtype).at[:, :out_dim].set(b2)
    else:
        w2p, b2p = w2, b2

    # --- Batch tiling: as few grid steps as the hardware wants (1 on v5e/v6e,
    # 2 on v7x), multiple-of-8 tiles, capped so huge batches still pipeline. ---
    n_min = _grid_steps_for_device()
    tile_b = _round_up(max(pl.cdiv(B, n_min), _SUBLANE), _SUBLANE)
    tile_b = min(tile_b, _round_up(max_tile_b, _SUBLANE))
    grid_n = pl.cdiv(B, tile_b)
    b_pad = grid_n * tile_b
    if b_pad != B:
        x_in = jnp.zeros((b_pad, in_dim), x.dtype).at[:B, :].set(x)
    else:
        x_in = x  # no wrapper-side pad copy when the tile divides B.

    kernel = functools.partial(
        _hopfield_kernel,
        apply_hopfield=apply_hopfield,
        use_bf16_matmul=use_bf16_matmul,
    )

    # Weights/biases: constant index_map -> loaded once, VMEM-resident across
    # all grid steps.  x / out: streamed per batch tile (auto double-buffered).
    in_specs = [
        pl.BlockSpec((tile_b, in_dim), lambda i: (i, 0)),           # x
        pl.BlockSpec((in_dim, hidden_dim), lambda i: (0, 0)),       # w1
        pl.BlockSpec((1, hidden_dim), lambda i: (0, 0)),            # b1
    ]
    operands = [x_in, w1, b1]
    if apply_hopfield:
        in_specs += [
            pl.BlockSpec((hidden_dim, hidden_dim), lambda i: (0, 0)),  # wh
            pl.BlockSpec((1, hidden_dim), lambda i: (0, 0)),           # bh
        ]
        operands += [wh, bh]
    in_specs += [
        pl.BlockSpec((hidden_dim, out_pad), lambda i: (0, 0)),      # w2 (padded)
        pl.BlockSpec((1, out_pad), lambda i: (0, 0)),               # b2 (padded)
    ]
    operands += [w2p, b2p]

    out_spec = pl.BlockSpec((tile_b, out_pad), lambda i: (i, 0))

    y_padded = pl.pallas_call(
        kernel,
        out_shape=jax.ShapeDtypeStruct((b_pad, out_pad), jnp.float32),
        grid=(grid_n,),
        in_specs=in_specs,
        out_specs=out_spec,
        compiler_params=pltpu.CompilerParams(
            dimension_semantics=("parallel",),  # shards batch tiles across TCs on v7x
        ),
    )(*operands)

    # Slice away batch / lane padding.
    return y_padded[:B, :out_dim]


def hopfield_reference(x, w1, b1, wh, bh, w2, b2, *, recurrent_generations: int):
    """Literal re-implementation of the PyTorch forward (loop kept verbatim)."""
    h = jax.nn.sigmoid(x @ w1 + b1)
    rec = h
    for _ in range(recurrent_generations):
        rec = jnp.maximum(h @ wh + bh, 0.0)   # applied to h every iteration
    return jax.nn.sigmoid(rec @ w2 + b2)


if __name__ == "__main__":
    # Small shapes consistent with the module's Linear layers.
    B, IN_DIM, HIDDEN_DIM, OUT_DIM = 64, 32, 32, 16
    RECURRENT_GENERATIONS = 3

    key = jax.random.PRNGKey(0)
    kx, k1w, k1b, khw, k2w, k2b = jax.random.split(key, 6)

    x = jax.random.normal(kx, (B, IN_DIM), dtype=jnp.float32)

    # linear1: PyTorch default uniform init (bound = 1/sqrt(fan_in)).
    bound1 = 1.0 / (IN_DIM ** 0.5)
    w1 = jax.random.uniform(k1w, (IN_DIM, HIDDEN_DIM), minval=-bound1, maxval=bound1)
    b1 = jax.random.uniform(k1b, (1, HIDDEN_DIM), minval=-bound1, maxval=bound1)

    # HopfieldLayer linear: weight ~ U(-1, 1), bias = 0 (per torch.nn.init in __init__).
    wh = jax.random.uniform(khw, (HIDDEN_DIM, HIDDEN_DIM), minval=-1.0, maxval=1.0)
    bh = jnp.zeros((1, HIDDEN_DIM), dtype=jnp.float32)

    # linear2.
    bound2 = 1.0 / (HIDDEN_DIM ** 0.5)
    w2 = jax.random.uniform(k2w, (HIDDEN_DIM, OUT_DIM), minval=-bound2, maxval=bound2)
    b2 = jax.random.uniform(k2b, (1, OUT_DIM), minval=-bound2, maxval=bound2)

    y_ref = hopfield_reference(
        x, w1, b1, wh, bh, w2, b2, recurrent_generations=RECURRENT_GENERATIONS
    )

    # 1) Default fast path (bf16 MXU operands) -- loose tolerance vs f32 reference.
    y_fast = hopfield_forward(
        x, w1, b1, wh, bh, w2, b2,
        recurrent_generations=RECURRENT_GENERATIONS, use_bf16_matmul=True,
    )
    jax.block_until_ready(y_fast)
    assert y_fast.shape == (B, OUT_DIM)
    assert jnp.allclose(y_fast, y_ref, atol=3e-2, rtol=3e-2)

    # 2) Exact f32 path -- tight tolerance.
    y_f32 = hopfield_forward(
        x, w1, b1, wh, bh, w2, b2,
        recurrent_generations=RECURRENT_GENERATIONS, use_bf16_matmul=False,
    )
    jax.block_until_ready(y_f32)
    assert jnp.allclose(y_f32, y_ref, atol=2e-5, rtol=2e-5)

    # 3) R == 0 pass-through branch (Wh/bh dropped from the pallas_call entirely).
    y0 = hopfield_forward(
        x, w1, b1, wh, bh, w2, b2, recurrent_generations=0, use_bf16_matmul=False
    )
    y0_ref = hopfield_reference(x, w1, b1, wh, bh, w2, b2, recurrent_generations=0)
    jax.block_until_ready(y0)
    assert jnp.allclose(y0, y0_ref, atol=2e-5, rtol=2e-5)

    print("KERNEL_OK")
</pallas_src>

<mosaic_0001>
module attributes {stable_mosaic.version = 11 : i64} {
  func.func @_hopfield_kernel(%arg0: i32, %arg1: memref<64x32xf32, #tpu.memory_space<vmem>>, %arg2: memref<32x32xf32, #tpu.memory_space<vmem>>, %arg3: memref<1x32xf32, #tpu.memory_space<vmem>>, %arg4: memref<32x32xf32, #tpu.memory_space<vmem>>, %arg5: memref<1x32xf32, #tpu.memory_space<vmem>>, %arg6: memref<32x128xf32, #tpu.memory_space<vmem>>, %arg7: memref<1x128xf32, #tpu.memory_space<vmem>>, %arg8: memref<64x128xf32, #tpu.memory_space<vmem>>) attributes {dimension_semantics = [#tpu.dimension_semantics<parallel>], iteration_bounds = array<i64: 1>, scalar_prefetch = 0 : i64, scratch_operands = 0 : i64, tpu.core_type = #tpu.core_type<tc>, window_params = [{transform_indices = @transform_0, window_bounds = array<i64: 64, 32>}, {pipeline_mode = #tpu.pipeline_mode<synchronous>, transform_indices = @transform_1, window_bounds = array<i64: 32, 32>}, {pipeline_mode = #tpu.pipeline_mode<synchronous>, transform_indices = @transform_2, window_bounds = array<i64: 1, 32>}, {pipeline_mode = #tpu.pipeline_mode<synchronous>, transform_indices = @transform_3, window_bounds = array<i64: 32, 32>}, {pipeline_mode = #tpu.pipeline_mode<synchronous>, transform_indices = @transform_4, window_bounds = array<i64: 1, 32>}, {pipeline_mode = #tpu.pipeline_mode<synchronous>, transform_indices = @transform_5, window_bounds = array<i64: 32, 128>}, {pipeline_mode = #tpu.pipeline_mode<synchronous>, transform_indices = @transform_6, window_bounds = array<i64: 1, 128>}, {transform_indices = @transform_7, window_bounds = array<i64: 64, 128>}]} {
    %c0 = arith.constant 0 : index
    %c0_0 = arith.constant 0 : index
    %0 = vector.load %arg1[%c0, %c0_0] : memref<64x32xf32, #tpu.memory_space<vmem>>, vector<64x32xf32>
    %c0_1 = arith.constant 0 : index
    %c0_2 = arith.constant 0 : index
    %1 = vector.load %arg2[%c0_1, %c0_2] : memref<32x32xf32, #tpu.memory_space<vmem>>, vector<32x32xf32>
    %2 = arith.truncf %0 : vector<64x32xf32> to vector<64x32xbf16>
    %3 = arith.truncf %1 : vector<32x32xf32> to vector<32x32xbf16>
    %cst = arith.constant dense<0.000000e+00> : vector<64x32xf32>
    %4 = tpu.matmul %2, %3, %cst {dimension_numbers = #tpu.dot_dimension_numbers<[1], [0], [0], [1], [0, 0, 1, 1], [], []>} : vector<64x32xbf16>, vector<32x32xbf16>, vector<64x32xf32> -> vector<64x32xf32>
    %c0_3 = arith.constant 0 : index
    %c0_4 = arith.constant 0 : index
    %5 = vector.load %arg3[%c0_3, %c0_4] : memref<1x32xf32, #tpu.memory_space<vmem>>, vector<1x32xf32>
    %6 = vector.broadcast %5 : vector<1x32xf32> to vector<64x32xf32>
    %7 = arith.addf %4, %6 : vector<64x32xf32>
    %8 = arith.negf %7 : vector<64x32xf32>
    %9 = math.exp %8 : vector<64x32xf32>
    %cst_5 = arith.constant 1.000000e+00 : f32
    %10 = vector.broadcast %cst_5 : f32 to vector<64x32xf32>
    %11 = arith.addf %10, %9 : vector<64x32xf32>
    %12 = arith.divf %10, %11 : vector<64x32xf32>
    %c0_6 = arith.constant 0 : index
    %c0_7 = arith.constant 0 : index
    %13 = vector.load %arg4[%c0_6, %c0_7] : memref<32x32xf32, #tpu.memory_space<vmem>>, vector<32x32xf32>
    %14 = arith.truncf %12 : vector<64x32xf32> to vector<64x32xbf16>
    %15 = arith.truncf %13 : vector<32x32xf32> to vector<32x32xbf16>
    %cst_8 = arith.constant dense<0.000000e+00> : vector<64x32xf32>
    %16 = tpu.matmul %14, %15, %cst_8 {dimension_numbers = #tpu.dot_dimension_numbers<[1], [0], [0], [1], [0, 0, 1, 1], [], []>} : vector<64x32xbf16>, vector<32x32xbf16>, vector<64x32xf32> -> vector<64x32xf32>
    %c0_9 = arith.constant 0 : index
    %c0_10 = arith.constant 0 : index
    %17 = vector.load %arg5[%c0_9, %c0_10] : memref<1x32xf32, #tpu.memory_space<vmem>>, vector<1x32xf32>
    %18 = vector.broadcast %17 : vector<1x32xf32> to vector<64x32xf32>
    %19 = arith.addf %16, %18 : vector<64x32xf32>
    %cst_11 = arith.constant 0.000000e+00 : f32
    %20 = vector.broadcast %cst_11 : f32 to vector<64x32xf32>
    %21 = arith.maximumf %19, %20 : vector<64x32xf32>
    %c0_12 = arith.constant 0 : index
    %c0_13 = arith.constant 0 : index
    %22 = vector.load %arg6[%c0_12, %c0_13] : memref<32x128xf32, #tpu.memory_space<vmem>>, vector<32x128xf32>
    %23 = arith.truncf %21 : vector<64x32xf32> to vector<64x32xbf16>
    %24 = arith.truncf %22 : vector<32x128xf32> to vector<32x128xbf16>
    %cst_14 = arith.constant dense<0.000000e+00> : vector<64x128xf32>
    %25 = tpu.matmul %23, %24, %cst_14 {dimension_numbers = #tpu.dot_dimension_numbers<[1], [0], [0], [1], [0, 0, 1, 1], [], []>} : vector<64x32xbf16>, vector<32x128xbf16>, vector<64x128xf32> -> vector<64x128xf32>
    %c0_15 = arith.constant 0 : index
    %c0_16 = arith.constant 0 : index
    %26 = vector.load %arg7[%c0_15, %c0_16] : memref<1x128xf32, #tpu.memory_space<vmem>>, vector<1x128xf32>
    %27 = vector.broadcast %26 : vector<1x128xf32> to vector<64x128xf32>
    %28 = arith.addf %25, %27 : vector<64x128xf32>
    %29 = arith.negf %28 : vector<64x128xf32>
    %30 = math.exp %29 : vector<64x128xf32>
    %cst_17 = arith.constant 1.000000e+00 : f32
    %31 = vector.broadcast %cst_17 : f32 to vector<64x128xf32>
    %32 = arith.addf %31, %30 : vector<64x128xf32>
    %33 = arith.divf %31, %32 : vector<64x128xf32>
    %c0_18 = arith.constant 0 : index
    %c0_19 = arith.constant 0 : index
    %34 = vector.load %arg8[%c0_18, %c0_19] : memref<64x128xf32, #tpu.memory_space<vmem>>, vector<64x128xf32>
    tpu.vector_store %arg8[%c0_18, %c0_19], %33 {strides = array<i32>} : memref<64x128xf32, #tpu.memory_space<vmem>>, vector<64x128xf32>,
    return
  }
  func.func @transform_0(%arg0: i32) -> (i32, i32) {
    %c0_i32 = arith.constant 0 : i32
    %c0_i32_0 = arith.constant 0 : i32
    return %arg0, %c0_i32 : i32, i32
  }
  func.func @transform_1(%arg0: i32) -> (i32, i32) {
    %c0_i32 = arith.constant 0 : i32
    %c0_i32_0 = arith.constant 0 : i32
    %c0_i32_1 = arith.constant 0 : i32
    return %c0_i32, %c0_i32_0 : i32, i32
  }
  func.func @transform_2(%arg0: i32) -> (i32, i32) {
    %c0_i32 = arith.constant 0 : i32
    %c0_i32_0 = arith.constant 0 : i32
    %c0_i32_1 = arith.constant 0 : i32
    return %c0_i32, %c0_i32_0 : i32, i32
  }
  func.func @transform_3(%arg0: i32) -> (i32, i32) {
    %c0_i32 = arith.constant 0 : i32
    %c0_i32_0 = arith.constant 0 : i32
    %c0_i32_1 = arith.constant 0 : i32
    return %c0_i32, %c0_i32_0 : i32, i32
  }
  func.func @transform_4(%arg0: i32) -> (i32, i32) {
    %c0_i32 = arith.constant 0 : i32
    %c0_i32_0 = arith.constant 0 : i32
    %c0_i32_1 = arith.constant 0 : i32
    return %c0_i32, %c0_i32_0 : i32, i32
  }
  func.func @transform_5(%arg0: i32) -> (i32, i32) {
    %c0_i32 = arith.constant 0 : i32
    %c0_i32_0 = arith.constant 0 : i32
    %c0_i32_1 = arith.constant 0 : i32
    return %c0_i32, %c0_i32_0 : i32, i32
  }
  func.func @transform_6(%arg0: i32) -> (i32, i32) {
    %c0_i32 = arith.constant 0 : i32
    %c0_i32_0 = arith.constant 0 : i32
    %c0_i32_1 = arith.constant 0 : i32
    return %c0_i32, %c0_i32_0 : i32, i32
  }
  func.func @transform_7(%arg0: i32) -> (i32, i32) {
    %c0_i32 = arith.constant 0 : i32
    %c0_i32_0 = arith.constant 0 : i32
    return %arg0, %c0_i32 : i32, i32
  }
}

</mosaic_0001>

<bundles_post_ra>
// kernel: tpu_custom_call.1
= control target key start
LH: loop header
LB: loop body
LE: loop exit
PB: predicated region body
PF: predicated region fallthrough
CT: control target
= control target key end

     0   :  { %vm53_vm0 = vcmask 261120   ;;  %s763_s0 = inlined_call_operand.vmem [shape: f32[64,32], index: 0, kind: input, shape index: {}]   ;;  %s764_s1 = inlined_call_operand.vmem [shape: f32[32,32], index: 1, kind: input, shape index: {}]   ;;  %s765_s2 = inlined_call_operand.vmem [shape: f32[1,32], index: 2, kind: input, shape index: {}]   ;;  %s766_s3 = inlined_call_operand.vmem [shape: f32[32,32], index: 3, kind: input, shape index: {}]   ;;  %s767_s4 = inlined_call_operand.vmem [shape: f32[1,32], index: 4, kind: input, shape index: {}]   ;;  %s768_s5 = inlined_call_operand.vmem [shape: f32[32,128], index: 5, kind: input, shape index: {}]   ;;  %s769_s6 = inlined_call_operand.vmem [shape: f32[1,128], index: 6, kind: input, shape index: {}]   ;;  %s770_s7 = inlined_call_operand.hbm [shape: f32[64,128], index: 7, kind: output, shape index: {}]  }
   0x1   :  { %v36_v0 = vld [vmem:[%s764_s1] sm:$0xff]  ;;  %v37_v1 = vld [vmem:[%s764_s1 + $0x8] sm:$0xff]  ;;  %v38_v2 = vld [vmem:[%s764_s1 + $0x10] sm:$0xff] }
   0x2   :  { %v44_v3 = vpack.c.bf16 %v37_v1, %v36_v0  ;;  %v39_v4 = vld [vmem:[%s764_s1 + $0x18] sm:$0xff]  ;;  %v28_v5 = vld [vmem:[%s763_s0] sm:$0xff]  ;;  %v29_v6 = vld [vmem:[%s763_s0 + $0x8] sm:$0xff] }
   0x3   :  { %v45_v7 = vpack.c.bf16 %v39_v4, %v38_v2  ;;  %v40_v8 = vpack.c.bf16 %v29_v6, %v28_v5  ;;  %v32_v9 = vld [vmem:[%s763_s0 + $0x20] sm:$0xff]  ;;  %v30_v10 = vld [vmem:[%s763_s0 + $0x10] sm:$0xff]  ;;  %v31_v11 = vld [vmem:[%s763_s0 + $0x18] sm:$0xff] }
   0x4   :  { %496 = vmatprep.subr.bf16.mxu0 %v44_v3  ;;  %532 = vmatprep.subr.bf16.mxu1 %v44_v3  ;;  %v33_v12 = vld [vmem:[%s763_s0 + $0x28] sm:$0xff]  ;;  %v34_v14 = vld [vmem:[%s763_s0 + $0x30] sm:$0xff]  ;;  %v35_v15 = vld [vmem:[%s763_s0 + $0x38] sm:$0xff] }
   0x5   :  { %497 = vmatpush3.bf16.msra.mxu0 %v44_v3  ;;  %534 = vmatpush3.bf16.msra.mxu1 %v44_v3  ;;  %v42_v13 = vpack.c.bf16 %v33_v12, %v32_v9 }
   0x6   :  { %12 = vsyncpa [#allocation3], 0  ;;  %498 = vmatprep.subr.bf16.mxu0 %v45_v7  ;;  %500 = vmatprep.mubr.msk.bf16.mxu0 %vm53_vm0, %v40_v8  ;;  %v41_v16 = vpack.c.bf16 %v31_v11, %v30_v10  ;;  %v43_v17 = vpack.c.bf16 %v35_v15, %v34_v14  ;;  %v179_v18 = vld [vmem:[%s766_s3] sm:$0xff]  ;;  %v180_v19 = vld [vmem:[%s766_s3 + $0x8] sm:$0xff] }
   0x7   :  { %533 = vmatprep.subr.bf16.mxu1 %v45_v7  ;;  %504 = vmatprep.mubr.msk.bf16.mxu1 %vm53_vm0, %v42_v13  ;;  %v187_v20 = vpack.c.bf16 %v180_v19, %v179_v18  ;;  %v181_v21 = vld [vmem:[%s766_s3 + $0x10] sm:$0xff]  ;;  %v182_v22 = vld [vmem:[%s766_s3 + $0x18] sm:$0xff]  ;;  %v447_v24 = vld [vmem:[%s765_s2] ss:$0 sm:$0xff] }
   0x8   :  { %v188_v23 = vpack.c.bf16 %v182_v22, %v181_v21  ;;  %v281_v13 = vld [vmem:[%s768_s5] sm:$0xff]  ;;  %v282_v14 = vld [vmem:[%s768_s5 + $0x8] sm:$0xff] }
   0x9   :  { %499 = vmatpush3.bf16.msra.mxu0 %v45_v7  ;;  %535 = vmatpush3.bf16.msra.mxu1 %v45_v7  ;;  %v289_v15 = vpack.c.bf16 %v282_v14, %v281_v13  ;;  %v460_v19 = vld [vmem:[%s767_s4] ss:$0 sm:$0xff] }
   0xa   :  { %508 = vmatprep.subr.bf16.mxu1 %v187_v20 }
   0xb   :  { %520 = vmatprep.subr.bf16.mxu0 %v289_v15 }
   0xc   :  { %501 = vmatmul.mubr.msk.bf16.vlgmr.msra.gmra.mrb[0].mxu0 %vm53_vm0, %v41_v16  ;;  %505 = vmatmul.mubr.msk.bf16.vlgmr.msra.gmra.mrb[0].mxu1 %vm53_vm0, %v43_v17  ;;  %v283_v16 = vld [vmem:[%s768_s5 + $0x10] sm:$0xff]  ;;  %v284_v17 = vld [vmem:[%s768_s5 + $0x18] sm:$0xff] }
   0xd   :  { %509 = vmatpush3.bf16.msra.mxu1 %v187_v20  ;;  %521 = vmatpush3.bf16.msra.mxu0 %v289_v15  ;;  %v290_v18 = vpack.c.bf16 %v284_v17, %v283_v16 }
   0xe   :  { %510 = vmatprep.subr.bf16.mxu1 %v188_v23 }
   0xf   :  { %522 = vmatprep.subr.bf16.mxu0 %v290_v18 }
  0x11   :  { %511 = vmatpush3.bf16.msra.mxu1 %v188_v23  ;;  %523 = vmatpush3.bf16.msra.mxu0 %v290_v18 }
  0xdf   :  { %v502_v25 = vpop.f32.mrb[0].mxu0  ;;  %v506_v26 = vpop.f32.mrb[0].mxu1 }
  0xe0   :  { %v109_v27 = vadd.f32 %v502_v25, %v447_v24  ;;  %v100_v28 = vpop.f32.mrb[1].mxu0  ;;  %v125_v29 = vadd.f32 %v506_v26, %v447_v24  ;;  %v116_v30 = vpop.f32.mrb[1].mxu1 }
  0xe1   :  { %v101_v31 = vadd.f32 %v447_v24, %v100_v28  ;;  %v503_v32 = vpop.f32.mrb[2].mxu0  ;;  %v117_v33 = vadd.f32 %v447_v24, %v116_v30  ;;  %v507_v34 = vpop.f32.mrb[2].mxu1 }
  0xe2   :  { %v454_v35 = vmul.f32 -1.442695, %v109_v27  ;;  %v112_v36 = vadd.f32 %v503_v32, %v447_v24  ;;  %v103_v37 = vpop.f32.mrb[3].mxu0  ;;  %v128_v38 = vadd.f32 %v507_v34, %v447_v24  ;;  %v119_v39 = vpop.f32.mrb[3].mxu1  ;;  %v458_v44 = vmul.f32 -1.442695, %v125_v29 }
  0xe3   :  { %v452_v40 = vmul.f32 -1.442695, %v101_v31  ;;  %v104_v41 = vadd.f32 %v447_v24, %v103_v37  ;;  %v120_v42 = vadd.f32 %v447_v24, %v119_v39  ;;  %v456_v46 = vmul.f32 -1.442695, %v117_v33 }
  0xe4   :  { %539 = vpow2.f32 %v454_v35  ;;  %v455_v43 = vmul.f32 -1.442695, %v112_v36  ;;  %v459_v47 = vmul.f32 -1.442695, %v128_v38 }
  0xe5   :  { %541 = vpow2.f32 %v452_v40  ;;  %v453_v45 = vmul.f32 -1.442695, %v104_v41  ;;  %v457_v48 = vmul.f32 -1.442695, %v120_v42 }
  0xe6   :  { %543 = vpow2.f32 %v455_v43 }
  0xe7   :  { %545 = vpow2.f32 %v453_v45 }
  0xe8   :  { %547 = vpow2.f32 %v458_v44 }
  0xe9   :  { %549 = vpow2.f32 %v456_v46 }
  0xea   :  { %551 = vpow2.f32 %v459_v47 }
  0xeb   :  { %553 = vpow2.f32 %v457_v48  ;;  %v465_v48 = vld [vmem:[%s769_s6] ss:$0 sm:$0xff]  ;;  %s627_s6 = smov [#allocation2]  }
  0xec   :  { %s436_s17 = sshll.u32 %s627_s6, 4  ;;  %s437_s17 = int_to_ptr.vmem [resolvable:$true] %s436_s17 }
  0xed   :  { %s603_s18 = scalar_lea.vmem %s437_s17, 1024  ;;  %p608_p1 = scmp.lt.s32.totalorder %s437_s17, %s437_s17 }
  0xee   :  { %v540_v49 = vpop.eup %539  ;;  %p604_p0 = scmp.ne.s32.totalorder %s437_s17, %s603_s18  ;;  %p609_p2 = scmp.lt.s32.totalorder %s603_s18, %s603_s18 }
  0xef   :  { %v542_v50 = vpop.eup %541  ;;  %v157_v51 = vadd.f32 1.0, %v540_v49 }
  0xf0   :  { %v544_v52 = vpop.eup %543  ;;  %v155_v53 = vadd.f32 1.0, %v542_v50  ;;  %p610_p3 = por %p609_p2, %p608_p1 }
  0xf1   :  { %v546_v54 = vpop.eup %545  ;;  %555 = vrcp.f32 %v157_v51  ;;  %v158_v55 = vadd.f32 1.0, %v544_v52 }
  0xf2   :  { %v548_v56 = vpop.eup %547  ;;  %557 = vrcp.f32 %v155_v53  ;;  %v156_v57 = vadd.f32 1.0, %v546_v54  ;;  %p611_p4 = pnand %p610_p3, %p604_p0 }
  0xf3   :  { %v550_v58 = vpop.eup %549  ;;  %559 = vrcp.f32 %v158_v55  ;;  %v161_v59 = vadd.f32 1.0, %v548_v56 }
  0xf4   :  { %v552_v60 = vpop.eup %551  ;;  %561 = vrcp.f32 %v156_v57  ;;  %v159_v61 = vadd.f32 1.0, %v550_v58 }
  0xf5   :  { %v554_v62 = vpop.eup %553  ;;  %563 = vrcp.f32 %v161_v59  ;;  %v162_v63 = vadd.f32 1.0, %v552_v60 }
  0xf6   :  { %565 = vrcp.f32 %v159_v61  ;;  %v160_v0 = vadd.f32 1.0, %v554_v62 }
  0xf7   :  { %567 = vrcp.f32 %v162_v63 }
  0xf8   :  { %569 = vrcp.f32 %v160_v0 }
  0xfb   :  { %v556_v1 = vpop.eup %555 }
  0xfc   :  { %v558_v2 = vpop.eup %557 }
  0xfd   :  { %v560_v3 = vpop.eup %559 }
  0xfe   :  { %v562_v4 = vpop.eup %561  ;;  %v184_v5 = vpack.c.bf16 %v560_v3, %v556_v1 }
  0xff   :  { %v564_v6 = vpop.eup %563  ;;  %v183_v7 = vpack.c.bf16 %v562_v4, %v558_v2 }
 0x100   :  { %v566_v8 = vpop.eup %565 }
 0x101   :  { %v568_v9 = vpop.eup %567  ;;  %512 = vmatprep.mubr.msk.bf16.mxu1 %vm53_vm0, %v183_v7 }
 0x102   :  { %v570_v10 = vpop.eup %569  ;;  %513 = vmatmul.mubr.msk.bf16.vlgmr.msra.gmra.mrb[4].mxu1 %vm53_vm0, %v184_v5  ;;  %v186_v11 = vpack.c.bf16 %v568_v9, %v564_v6 }
 0x103   :  { %v185_v12 = vpack.c.bf16 %v570_v10, %v566_v8 }
 0x105   :  { %516 = vmatprep.mubr.msk.bf16.mxu1 %vm53_vm0, %v185_v12 }
 0x10a   :  { %517 = vmatmul.mubr.msk.bf16.gmra.mrb[8].mxu1 %vm53_vm0, %v186_v11 }
 0x1d5   :  { %v514_v20 = vpop.f32.mrb[4].mxu1 }
 0x1d6   :  { %v251_v21 = vadd.f32 %v514_v20, %v460_v19  ;;  %v242_v22 = vpop.f32.mrb[5].mxu1 }
 0x1d7   :  { %v243_v23 = vadd.f32 %v460_v19, %v242_v22  ;;  %v515_v24 = vpop.f32.mrb[6].mxu1 }
 0x1d8   :  { %v254_v25 = vadd.f32 %v515_v24, %v460_v19  ;;  %v245_v26 = vpop.f32.mrb[7].mxu1  ;;  %v275_v28 = vmax.f32 %v251_v21, 0.0 }
 0x1d9   :  { %v246_v27 = vadd.f32 %v460_v19, %v245_v26  ;;  %v273_v30 = vmax.f32 %v243_v23, 0.0 }
 0x1da   :  { %v276_v29 = vmax.f32 %v254_v25, 0.0 }
 0x1db   :  { %v274_v31 = vmax.f32 %v246_v27, 0.0 }
 0x1dc   :  { %v286_v32 = vpack.c.bf16 %v276_v29, %v275_v28 }
 0x1dd   :  { %v285_v33 = vpack.c.bf16 %v274_v31, %v273_v30  ;;  %v518_v34 = vpop.f32.mrb[8].mxu1 }
 0x1de   :  { %v267_v35 = vadd.f32 %v518_v34, %v460_v19  ;;  %v258_v36 = vpop.f32.mrb[9].mxu1 }
 0x1df   :  { %v259_v37 = vadd.f32 %v460_v19, %v258_v36  ;;  %v519_v38 = vpop.f32.mrb[10].mxu1  ;;  %524 = vmatprep.mubr.msk.bf16.mxu0 %vm53_vm0, %v285_v33 }
 0x1e0   :  { %v270_v39 = vadd.f32 %v519_v38, %v460_v19  ;;  %v261_v40 = vpop.f32.mrb[11].mxu1  ;;  %525 = vmatmul.mubr.msk.bf16.vlgmr.msra.gmra.mrb[4].mxu0 %vm53_vm0, %v286_v32  ;;  %v279_v42 = vmax.f32 %v267_v35, 0.0 }
 0x1e1   :  { %v262_v41 = vadd.f32 %v460_v19, %v261_v40  ;;  %v277_v44 = vmax.f32 %v259_v37, 0.0 }
 0x1e2   :  { %v280_v43 = vmax.f32 %v270_v39, 0.0 }
 0x1e3   :  { %v278_v45 = vmax.f32 %v262_v41, 0.0 }
 0x1e4   :  { %v288_v46 = vpack.c.bf16 %v280_v43, %v279_v42 }
 0x1e5   :  { %v287_v47 = vpack.c.bf16 %v278_v45, %v277_v44 }
 0x1e7   :  { %528 = vmatprep.mubr.msk.bf16.mxu0 %vm53_vm0, %v287_v47 }
 0x1e8   :  { %529 = vmatmul.mubr.msk.bf16.gmra.mrb[8].mxu0 %vm53_vm0, %v288_v46 }
 0x2b3   :  { %v526_v49 = vpop.f32.mrb[4].mxu0 }
 0x2b4   :  { %v353_v50 = vadd.f32 %v526_v49, %v465_v48  ;;  %v344_v51 = vpop.f32.mrb[5].mxu0 }
 0x2b5   :  { %v345_v52 = vadd.f32 %v465_v48, %v344_v51  ;;  %v527_v53 = vpop.f32.mrb[6].mxu0 }
 0x2b6   :  { %v472_v54 = vmul.f32 -1.442695, %v353_v50  ;;  %v356_v55 = vadd.f32 %v527_v53, %v465_v48  ;;  %v347_v56 = vpop.f32.mrb[7].mxu0 }
 0x2b7   :  { %v470_v57 = vmul.f32 -1.442695, %v345_v52  ;;  %v348_v58 = vadd.f32 %v465_v48, %v347_v56 }
 0x2b8   :  { %571 = vpow2.f32 %v472_v54  ;;  %v473_v59 = vmul.f32 -1.442695, %v356_v55 }
 0x2b9   :  { %573 = vpow2.f32 %v470_v57  ;;  %v471_v60 = vmul.f32 -1.442695, %v348_v58 }
 0x2ba   :  { %575 = vpow2.f32 %v473_v59 }
 0x2bb   :  { %577 = vpow2.f32 %v471_v60  ;;  %v530_v61 = vpop.f32.mrb[8].mxu0 }
 0x2bc   :  { %v369_v62 = vadd.f32 %v530_v61, %v465_v48  ;;  %v360_v63 = vpop.f32.mrb[9].mxu0 }
 0x2bd   :  { %v361_v0 = vadd.f32 %v465_v48, %v360_v63  ;;  %v531_v1 = vpop.f32.mrb[10].mxu0 }
 0x2be   :  { %v476_v2 = vmul.f32 -1.442695, %v369_v62  ;;  %v372_v3 = vadd.f32 %v531_v1, %v465_v48  ;;  %v363_v4 = vpop.f32.mrb[11].mxu0 }
 0x2bf   :  { %v474_v5 = vmul.f32 -1.442695, %v361_v0  ;;  %v364_v6 = vadd.f32 %v465_v48, %v363_v4 }
 0x2c0   :  { %579 = vpow2.f32 %v476_v2  ;;  %v477_v7 = vmul.f32 -1.442695, %v372_v3 }
 0x2c1   :  { %581 = vpow2.f32 %v474_v5  ;;  %v475_v8 = vmul.f32 -1.442695, %v364_v6 }
 0x2c2   :  { %v572_v9 = vpop.eup %571  ;;  %583 = vpow2.f32 %v477_v7 }
 0x2c3   :  { %v574_v10 = vpop.eup %573  ;;  %v401_v11 = vadd.f32 1.0, %v572_v9  ;;  %585 = vpow2.f32 %v475_v8 }
 0x2c4   :  { %v576_v12 = vpop.eup %575  ;;  %v399_v13 = vadd.f32 1.0, %v574_v10 }
 0x2c5   :  { %v578_v14 = vpop.eup %577  ;;  %587 = vrcp.f32 %v401_v11  ;;  %v402_v15 = vadd.f32 1.0, %v576_v12 }
 0x2c6   :  { %589 = vrcp.f32 %v399_v13  ;;  %v400_v16 = vadd.f32 1.0, %v578_v14 }
 0x2c7   :  { %591 = vrcp.f32 %v402_v15 }
 0x2c8   :  { %593 = vrcp.f32 %v400_v16 }
 0x2ca   :  { %v580_v17 = vpop.eup %579 }
 0x2cb   :  { %v582_v18 = vpop.eup %581  ;;  %v405_v19 = vadd.f32 1.0, %v580_v17 }
 0x2cc   :  { %v584_v20 = vpop.eup %583  ;;  %v403_v21 = vadd.f32 1.0, %v582_v18 }
 0x2cd   :  { %v586_v22 = vpop.eup %585  ;;  %595 = vrcp.f32 %v405_v19  ;;  %v406_v23 = vadd.f32 1.0, %v584_v20 }
 0x2ce   :  { %597 = vrcp.f32 %v403_v21  ;;  %v404_v24 = vadd.f32 1.0, %v586_v22 }
 0x2cf   :  { %v588_v25 = vpop.eup %587  ;;  %599 = vrcp.f32 %v406_v23 }
 0x2d0   :  { %v590_v26 = vpop.eup %589  ;;  %425 = vst [vmem:[#allocation2 + $0x10] sm:$0xff] %v588_v25  ;;  %601 = vrcp.f32 %v404_v24 }
 0x2d1   :  { %v592_v27 = vpop.eup %591  ;;  %423 = vst [vmem:[#allocation2] sm:$0xff] %v590_v26 }
 0x2d2   :  { %v594_v28 = vpop.eup %593  ;;  %426 = vst [vmem:[#allocation2 + $0x18] sm:$0xff] %v592_v27 }
 0x2d3   :  { %424 = vst [vmem:[#allocation2 + $0x8] sm:$0xff] %v594_v28 }
 0x2d7   :  { %v596_v29 = vpop.eup %595 }
 0x2d8   :  { %v598_v30 = vpop.eup %597  ;;  %429 = vst [vmem:[#allocation2 + $0x30] sm:$0xff] %v596_v29 }
 0x2d9   :  { %v600_v31 = vpop.eup %599  ;;  %427 = vst [vmem:[#allocation2 + $0x20] sm:$0xff] %v598_v30 }
 0x2da   :  { %v602_v32 = vpop.eup %601  ;;  %430 = vst [vmem:[#allocation2 + $0x38] sm:$0xff] %v600_v31 }
 0x2db   :  { %428 = vst [vmem:[#allocation2 + $0x28] sm:$0xff] %v602_v32 }
 0x2dc   :  { %614 = shalt.err (!%p611_p4)
}
 0x2dd   :  { %s615_s21 = scalar_lea.hbm %s770_s7, 1024 }
 0x2de   :  { %p616_p5 = scmp.ne.s32.totalorder %s770_s7, %s615_s21  ;;  %p619_p6 = scmp.lt.u32.totalorder %s615_s21, %s770_s7 }
 0x2e0   :  { %p621_p7 = pnand %p619_p6, %p616_p5 }
 0x2e2   :  { %624 = shalt.err (!%p621_p7)
}
 0x2e3   :  { %s628_s0 = smov 128   ;;  %s629_s26 = smov 8  }
 0x2e4   :  { %442 = dma.vmem_to_hbm [thread:$0]  %s437_s17, 1024, %s770_s7, [#allocation3], %s628_s0, %s628_s0, %s629_s26  }
 0x2e5   :  { %625 = dma.done.wait [#allocation3], 1024  }
 0x2e6   :  { %626 = vsyncadd [#allocation3], 4294966272 }
 0x2e7   :  { %446 = vsyncpa [#allocation3], 1 }

</bundles_post_ra>
